<compile_context>
chip_gen: v7x
topology: tpu7x:2x2x1
jax: 0.10.0
libtpu: 0.0.40
codegen_flags: <defaults>
</compile_context>

<pallas_src>
import functools

import jax
import jax.numpy as jnp
from jax import lax
from jax.experimental import pallas as pl
from jax.experimental.pallas import tpu as pltpu

_LANE = 128
_SUBLANE = 8
# Above this fused-table size, stop making the table VMEM-resident and only
# DMA the requested rows (v5e default scoped VMEM is 16 MiB; leave headroom).
_SMALL_TABLE_BYTES = 8 * 1024 * 1024


def _round_up(x, m):
    return ((x + m - 1) // m) * m


# ---------------------------------------------------------------------------
# Path 1 (small table): one grid step, whole table HBM->VMEM once (single
# buffer, no pipeline double-buffering), gather = one-hot MXU matmul.
# ---------------------------------------------------------------------------
def _onehot_gather_kernel(ids_ref, table_hbm_ref, *rest):
    # ids_ref       : VMEM (B_pad, 1) int32
    # table_hbm_ref : HBM/ANY (R, D_pad)
    # rest          : (*out_refs, table_vmem, copy_sem)
    out_refs, table_vmem, copy_sem = rest[:-2], rest[-2], rest[-1]

    cp = pltpu.make_async_copy(table_hbm_ref, table_vmem, copy_sem.at[0])
    cp.start()
    cp.wait()

    r = table_vmem.shape[0]
    ids = ids_ref[...]                                          # (B_pad, 1)
    cols = lax.broadcasted_iota(jnp.int32, (ids.shape[0], r), 1)
    onehot = (cols == ids).astype(table_vmem.dtype)             # (B_pad, R)
    slab = jnp.dot(onehot, table_vmem[...],
                   preferred_element_type=jnp.float32)          # (B_pad, D_pad)

    off = 0
    for o_ref in out_refs:                    # per-field stores, no extra launches
        d = o_ref.shape[-1]
        o_ref[...] = slab[:, off:off + d].astype(o_ref.dtype)
        off += d


# ---------------------------------------------------------------------------
# Path 2 (large table): table stays in HBM; only the B requested rows are
# DMA'd (all row DMAs issued back-to-back, then waited).
# ---------------------------------------------------------------------------
def _hbm_row_gather_kernel(ids_ref, table_hbm_ref, *rest):
    # ids_ref       : SMEM (B_pad,) int32   (scalar prefetch)
    # table_hbm_ref : HBM/ANY (R, D_pad)
    # rest          : (*out_refs, rows_vmem, row_sems)
    out_refs, rows_vmem, row_sems = rest[:-2], rest[-2], rest[-1]
    n_rows = rows_vmem.shape[0]

    def row_copy(i):
        return pltpu.make_async_copy(
            table_hbm_ref.at[pl.ds(ids_ref[i], 1)],
            rows_vmem.at[pl.ds(i, 1)],
            row_sems.at[i])

    # B_pad is small & static -> fully unrolled, all DMAs in flight together.
    # TODO(synk): for large B, tile over (8, D_pad) row groups / lax.fori_loop
    # instead of a full unroll to bound code size and vreg pressure.
    for i in range(n_rows):
        row_copy(i).start()
    for i in range(n_rows):
        row_copy(i).wait()

    slab = rows_vmem[...]
    off = 0
    for o_ref in out_refs:
        d = o_ref.shape[-1]
        o_ref[...] = slab[:, off:off + d].astype(o_ref.dtype)
        off += d


def fused_embedding_gather(table, ids, field_dims, *, force_hbm_gather=False):
    """For each field f: out_f[i, :] = table[ids[i], off_f:off_f+dim_f]."""
    b = ids.shape[0]
    r, d_pad = table.shape
    b_pad = _round_up(max(b, _SUBLANE), _SUBLANE)   # unmasked sublane stores
    ids_pad = jnp.zeros((b_pad,), jnp.int32).at[:b].set(ids.astype(jnp.int32))

    out_shape = tuple(jax.ShapeDtypeStruct((b_pad, d), table.dtype)
                      for d in field_dims)
    table_bytes = r * d_pad * table.dtype.itemsize

    if (not force_hbm_gather) and table_bytes <= _SMALL_TABLE_BYTES:
        outs = pl.pallas_call(
            _onehot_gather_kernel,
            out_shape=out_shape,
            grid=(1,),
            in_specs=[
                pl.BlockSpec((b_pad, 1), lambda i: (0, 0)),     # ids (VMEM)
                pl.BlockSpec(memory_space=pl.ANY),              # table (HBM)
            ],
            out_specs=tuple(pl.BlockSpec((b_pad, d), lambda i: (0, 0))
                            for d in field_dims),
            scratch_shapes=[
                pltpu.VMEM((r, d_pad), table.dtype),   # single table buffer
                pltpu.SemaphoreType.DMA((1,)),
            ],
            compiler_params=pltpu.CompilerParams(
                dimension_semantics=("arbitrary",),
                vmem_limit_bytes=int(max(table_bytes + (4 << 20), 16 << 20)),
            ),
        )(ids_pad.reshape(b_pad, 1), table)
    else:
        outs = pl.pallas_call(
            _hbm_row_gather_kernel,
            out_shape=out_shape,
            grid_spec=pltpu.PrefetchScalarGridSpec(
                num_scalar_prefetch=1,                          # ids -> SMEM
                grid=(1,),
                in_specs=[pl.BlockSpec(memory_space=pl.ANY)],   # table in HBM
                out_specs=tuple(
                    pl.BlockSpec((b_pad, d), lambda i, ids_ref: (0, 0))
                    for d in field_dims),
                scratch_shapes=[
                    pltpu.VMEM((b_pad, d_pad), table.dtype),
                    pltpu.SemaphoreType.DMA((b_pad,)),
                ],
            ),
            compiler_params=pltpu.CompilerParams(
                dimension_semantics=("arbitrary",)),
        )(ids_pad, table)

    return tuple(o[:b] for o in outs)


@functools.partial(jax.jit,
                   static_argnames=("layout", "num_frames", "force_hbm_gather"))
def _forward_impl(fused_table, betas_row, frame_ids, layout, num_frames,
                  force_hbm_gather):
    b = frame_ids.shape[0]
    # Clamp so a bad frame id can never produce an out-of-range row read.
    ids = jnp.clip(frame_ids.astype(jnp.int32), 0, num_frames - 1)
    frame_dims = tuple(d for (_, d, is_betas) in layout if not is_betas)
    per_frame = (fused_embedding_gather(fused_table, ids, frame_dims,
                                        force_hbm_gather=force_hbm_gather)
                 if frame_dims else ())
    out, it = {}, iter(per_frame)
    for (key, d, is_betas) in layout:
        if is_betas:
            # 'betas' always gathers row 0 -> a free broadcast, never stored
            # or DMA'd per-frame.
            out[key] = jnp.broadcast_to(betas_row[:, :d], (b, d))
        else:
            out[key] = next(it)
    return out


class GenericParamsPallas:
    """JAX/Pallas port of GenericParams' forward: per-frame embedding gathers.

    forward(frame_ids) gathers one row per frame id from every per-frame table;
    'betas' always uses row 0 (zeros_like(frame_ids) in the PyTorch reference).
    Returned keys are prefixed with `node_id + '.'`.
    """

    def __init__(self, num_frames, params_dim, node_id, key=None):
        self.num_frames = num_frames
        self.params_dim = dict(params_dim)
        self.node_id = node_id
        self.tables = {}
        for name, dim in self.params_dim.items():
            rows = 1 if name == "betas" else num_frames
            if key is None:
                # Reference __init__ zero-fills nn.Embedding weights.
                tab = jnp.zeros((rows, dim), jnp.float32)
            else:
                key, sub = jax.random.split(key)
                tab = jax.random.normal(sub, (rows, dim), jnp.float32)
            self.tables[name] = tab
        self._rebuild_fused_table()
        # TODO(synk): freeze/defrost/set_requires_grad are autograd bookkeeping
        # (requires_grad flags) with no kernel-side equivalent.

    def init_parameters(self, param_name, data):
        """Mirror of the reference init_parameters: update weights + re-fuse."""
        dim = self.params_dim[param_name]
        self.tables[param_name] = jnp.asarray(data, jnp.float32)[..., :dim]
        self._rebuild_fused_table()

    def _rebuild_fused_table(self):
        parts, layout, off = [], [], 0
        for name, dim in self.params_dim.items():
            key = self.node_id + "." + name
            if name == "betas":
                layout.append((key, dim, True))
            else:
                parts.append(self.tables[name])
                layout.append((key, dim, False))
                off += dim
        if parts:
            fused = jnp.concatenate(parts, axis=1)        # (num_frames, off)
            d_pad = _round_up(off, _LANE)                 # lane-dense last dim
            if d_pad > off:
                fused = jnp.pad(fused, ((0, 0), (0, d_pad - off)))
        else:
            fused = jnp.zeros((max(self.num_frames, 1), _LANE), jnp.float32)
        self._fused_table = fused                         # (num_frames, D_pad)
        betas = self.tables.get("betas")
        self._betas_row = (betas[0:1, :] if betas is not None
                           else jnp.zeros((1, 1), jnp.float32))
        self._layout = tuple(layout)                      # static & hashable

    def forward(self, frame_ids, force_hbm_gather=False):
        return _forward_impl(self._fused_table, self._betas_row, frame_ids,
                             self._layout, self.num_frames,
                             bool(force_hbm_gather))


if __name__ == "__main__":
    key = jax.random.PRNGKey(0)
    num_frames = 16
    params_dim = {"pose": 72, "transl": 3, "betas": 10}
    node_id = "object"

    k_tab, k_ids = jax.random.split(key)
    # Random (non-zero) weights so the correctness check is meaningful; the
    # reference zero-fills in __init__ and sets real data via init_parameters.
    model = GenericParamsPallas(num_frames, params_dim, node_id, key=k_tab)

    B = 8
    frame_ids = jax.random.randint(k_ids, (B,), 0, num_frames, dtype=jnp.int32)

    def check(params):
        for name, table in model.tables.items():
            ids = jnp.zeros_like(frame_ids) if name == "betas" else frame_ids
            ref = jnp.take(table, ids, axis=0)
            got = params[node_id + "." + name]
            assert got.shape == ref.shape and got.dtype == ref.dtype, name
            assert bool(jnp.allclose(got, ref)), f"mismatch for {name}"

    # Small-table path: one-hot MXU gather over the VMEM-resident fused table.
    params = model.forward(frame_ids)
    params = jax.tree_util.tree_map(jax.block_until_ready, params)
    check(params)

    # Large-table path: table stays in HBM, only the B requested rows DMA'd.
    params_hbm = model.forward(frame_ids, force_hbm_gather=True)
    params_hbm = jax.tree_util.tree_map(jax.block_until_ready, params_hbm)
    check(params_hbm)

    print("KERNEL_OK")
</pallas_src>

<mosaic_0001>
module attributes {stable_mosaic.version = 11 : i64} {
  func.func @_onehot_gather_kernel(%arg0: i32, %arg1: memref<8x1xi32, #tpu.memory_space<vmem>>, %arg2: memref<16x128xf32, #tpu.memory_space<any>>, %arg3: memref<8x72xf32, #tpu.memory_space<vmem>>, %arg4: memref<8x3xf32, #tpu.memory_space<vmem>>, %arg5: memref<16x128xf32, #tpu.memory_space<vmem>>, %arg6: memref<1x!tpu.dma_semaphore, #tpu.memory_space<semaphore_mem>>) attributes {dimension_semantics = [#tpu.dimension_semantics<arbitrary>], iteration_bounds = array<i64: 1>, scalar_prefetch = 0 : i64, scratch_operands = 2 : i64, tpu.core_type = #tpu.core_type<tc>, window_params = [{pipeline_mode = #tpu.pipeline_mode<synchronous>, transform_indices = @transform_0, window_bounds = array<i64: 8, 1>}, {}, {pipeline_mode = #tpu.pipeline_mode<synchronous>, transform_indices = @transform_2, window_bounds = array<i64: 8, 72>}, {pipeline_mode = #tpu.pipeline_mode<synchronous>, transform_indices = @transform_3, window_bounds = array<i64: 8, 3>}]} {
    %c0_i32 = arith.constant 0 : i32
    %0 = tpu.memref_slice %arg6[%c0_i32] : memref<1x!tpu.dma_semaphore, #tpu.memory_space<semaphore_mem>> -> memref<1x!tpu.dma_semaphore, #tpu.memory_space<semaphore_mem>>
    %1 = tpu.memref_squeeze %0 : memref<1x!tpu.dma_semaphore, #tpu.memory_space<semaphore_mem>> -> memref<!tpu.dma_semaphore, #tpu.memory_space<semaphore_mem>>
    tpu.enqueue_dma source(%arg2 : memref<16x128xf32, #tpu.memory_space<any>>) target(%arg5 : memref<16x128xf32, #tpu.memory_space<vmem>>) target_semaphore(%1 : memref<!tpu.dma_semaphore, #tpu.memory_space<semaphore_mem>>)
    %c0_i32_0 = arith.constant 0 : i32
    %2 = tpu.memref_slice %arg6[%c0_i32_0] : memref<1x!tpu.dma_semaphore, #tpu.memory_space<semaphore_mem>> -> memref<1x!tpu.dma_semaphore, #tpu.memory_space<semaphore_mem>>
    %3 = tpu.memref_squeeze %2 : memref<1x!tpu.dma_semaphore, #tpu.memory_space<semaphore_mem>> -> memref<!tpu.dma_semaphore, #tpu.memory_space<semaphore_mem>>
    tpu.wait_dma2 semaphore(%3 : memref<!tpu.dma_semaphore, #tpu.memory_space<semaphore_mem>>) src(%arg2 : memref<16x128xf32, #tpu.memory_space<any>>) dst(%arg5 : memref<16x128xf32, #tpu.memory_space<vmem>>)
    %c0 = arith.constant 0 : index
    %c0_1 = arith.constant 0 : index
    %4 = vector.load %arg1[%c0, %c0_1] : memref<8x1xi32, #tpu.memory_space<vmem>>, vector<8x1xi32>
    %5 = tpu.iota {dimensions = array<i32: 1>} : vector<8x16xi32>
    %6 = vector.broadcast %4 : vector<8x1xi32> to vector<8x16xi32>
    %7 = arith.cmpi eq, %5, %6 : vector<8x16xi32>
    %8 = arith.extui %7 : vector<8x16xi1> to vector<8x16xi32>
    %9 = arith.sitofp %8 : vector<8x16xi32> to vector<8x16xf32>
    %c0_2 = arith.constant 0 : index
    %c0_3 = arith.constant 0 : index
    %10 = vector.load %arg5[%c0_2, %c0_3] : memref<16x128xf32, #tpu.memory_space<vmem>>, vector<16x128xf32>
    %cst = arith.constant dense<0.000000e+00> : vector<8x128xf32>
    %11 = tpu.matmul %9, %10, %cst {dimension_numbers = #tpu.dot_dimension_numbers<[1], [0], [0], [1], [0, 0, 1, 1], [], []>} : vector<8x16xf32>, vector<16x128xf32>, vector<8x128xf32> -> vector<8x128xf32>
    %12 = vector.extract_strided_slice %11 {offsets = [0, 0], sizes = [8, 72], strides = [1, 1]} : vector<8x128xf32> to vector<8x72xf32>
    %c0_4 = arith.constant 0 : index
    %c0_5 = arith.constant 0 : index
    %13 = vector.load %arg3[%c0_4, %c0_5] : memref<8x72xf32, #tpu.memory_space<vmem>>, vector<8x72xf32>
    tpu.vector_store %arg3[%c0_4, %c0_5], %12 {strides = array<i32>} : memref<8x72xf32, #tpu.memory_space<vmem>>, vector<8x72xf32>,
    %14 = vector.extract_strided_slice %11 {offsets = [0, 72], sizes = [8, 3], strides = [1, 1]} : vector<8x128xf32> to vector<8x3xf32>
    %c0_6 = arith.constant 0 : index
    %c0_7 = arith.constant 0 : index
    %15 = vector.load %arg4[%c0_6, %c0_7] : memref<8x3xf32, #tpu.memory_space<vmem>>, vector<8x3xf32>
    tpu.vector_store %arg4[%c0_6, %c0_7], %14 {strides = array<i32>} : memref<8x3xf32, #tpu.memory_space<vmem>>, vector<8x3xf32>,
    return
  }
  func.func @transform_0(%arg0: i32) -> (i32, i32) {
    %c0_i32 = arith.constant 0 : i32
    %c0_i32_0 = arith.constant 0 : i32
    %c0_i32_1 = arith.constant 0 : i32
    return %c0_i32, %c0_i32_0 : i32, i32
  }
  func.func @transform_2(%arg0: i32) -> (i32, i32) {
    %c0_i32 = arith.constant 0 : i32
    %c0_i32_0 = arith.constant 0 : i32
    %c0_i32_1 = arith.constant 0 : i32
    return %c0_i32, %c0_i32_0 : i32, i32
  }
  func.func @transform_3(%arg0: i32) -> (i32, i32) {
    %c0_i32 = arith.constant 0 : i32
    %c0_i32_0 = arith.constant 0 : i32
    %c0_i32_1 = arith.constant 0 : i32
    return %c0_i32, %c0_i32_0 : i32, i32
  }
}

</mosaic_0001>

<bundles_post_ra>
// kernel: _forward_impl.1
= control target key start
LH: loop header
LB: loop body
LE: loop exit
PB: predicated region body
PF: predicated region fallthrough
CT: control target
= control target key end

     0   :  { %9 = vsyncpa [#allocation5], 0  ;;  %s283_s0 = inlined_call_operand.vmem [shape: s32[8,1], index: 0, kind: input, shape index: {}]   ;;  %s284_s1 = inlined_call_operand.vmem [shape: f32[16,128], index: 1, kind: input, shape index: {}]   ;;  %s285_s2 = inlined_call_operand.hbm [shape: f32[8,72], index: 2, kind: output, shape index: {0}]   ;;  %s286_s3 = inlined_call_operand.vmem [shape: f32[8,3], index: 3, kind: output, shape index: {1}]  }
   0x1   :  { %v44_v0 = vld [vmem:[%s284_s1] sm:$0xff]  ;;  %v46_v1 = vld [vmem:[%s284_s1 + $0x8] sm:$0xff] }
   0x2   :  { %55 = vsyncadd [#allocation3], 256 }
   0x3   :  { %229 = dma.done.wait [#allocation3], 256 }
   0x4   :  { %230 = vsyncadd [#allocation3], 4294967040  ;;  %v198_v2 = vpack.c.bf16 %v46_v1, %v44_v0  ;;  %v233_v3 = vmov 0   ;;  %v234_v4 = vmov 0.0|0.0   ;;  %v59_v5 = vld [vmem:[%s283_s0] sm:$0xff]  ;;  %vm235_vm0 = vmmov 0  }
   0x5   :  { %206 = vset.pattern.permute.xlu0 %v233_v3  ;;  %197 = vmatprep.subr.bf16.mxu0 %v234_v4  ;;  %v236_v6 = vmov 0.0   ;;  %v60_v7 = vlaneseq  ;;  %vm70_vm1 = vcmask 130048   ;;  %s237_s1 = smov [#allocation4]   ;;  %vm144_vm3 = vcmask 588800   ;;  %s238_s19 = smov 56  }
   0x6   :  { %199 = vmatpush3.bf16.msra.mxu0 %v198_v2  ;;  %63 = vperm.xlu0 %206, %v59_v5   ;;  %s158_s18 = sshll.u32 %s237_s1, 4  ;;  %s159_s18 = int_to_ptr.vmem [resolvable:$true] %s158_s18 }
   0x7   :  { %194 = vmatprep.mubr.msk.f32.mxu0 %vm235_vm0, %v236_v6  ;;  %v61_v8 = vand.u32 127, %v60_v7  ;;  %s207_s0 = scalar_lea.vmem %s159_s18, 128  ;;  %p212_p1 = scmp.lt.s32.totalorder %s159_s18, %s159_s18 }
   0x8   :  { %p208_p0 = scmp.ne.s32.totalorder %s159_s18, %s207_s0  ;;  %p213_p2 = scmp.lt.s32.totalorder %s207_s0, %s207_s0 }
   0xa   :  { %p214_p3 = por %p213_p2, %p212_p1 }
   0xc   :  { %p215_p4 = pnand %p214_p3, %p208_p0 }
  0x85   :  { %v64_v9 = vpop.permute.xlu0 %63 }
  0x86   :  { %vm65_vm2 = vcmp.eq.s32.totalorder %v61_v8, %v64_v9 }
  0x87   :  { %v184_v10 = vsel %vm65_vm2, 1.0, %v236_v6 }
  0x88   :  { %195 = vmatmul.mubr.msk.f32.vlgmr.msra.gmra.mrb[0].mxu0 %vm70_vm1, %v184_v10 }
 0x15b   :  { %v140_v11 = vpop.f32.mrb[0].mxu0 }
 0x15c   :  { %147 = vrot.lane.b32.xlu0 %v140_v11, %s238_s19  ;;  %v196_v12 = vpop.f32.mrb[1].mxu0  ;;  %145 = vst.msk [vmem:[#allocation4] sm:$0xff] %vm144_vm3, %v140_v11 }
 0x15d   :  { %218 = shalt.err (!%p215_p4)
}
 0x15e   :  { %s219_s22 = scalar_lea.hbm %s285_s2, 128 }
 0x15f   :  { %p220_p5 = scmp.ne.s32.totalorder %s285_s2, %s219_s22  ;;  %p223_p6 = scmp.lt.u32.totalorder %s219_s22, %s285_s2 }
 0x161   :  { %p225_p7 = pnand %p223_p6, %p220_p5 }
 0x163   :  { %228 = shalt.err (!%p225_p7)
}
 0x164   :  { %161 = dma.vmem_to_hbm [thread:$0]  %s159_s18, 128, %s285_s2, [#allocation5]   ;;  %vm150_vm4 = vcmask 23552  }
 0x1ce   :  { %v148_v13 = vpop.permute.xlu0 %147 }
 0x1cf   :  { %151 = vst.msk [vmem:[%s286_s3] sm:$0xff] %vm150_vm4, %v148_v13 }
 0x1d0   :  { %231 = dma.done.wait [#allocation5], 128  }
 0x1d1   :  { %232 = vsyncadd [#allocation5], 4294967168 }
 0x1d2   :  { %169 = vsyncpa [#allocation5], 1 }
 0x1d3   :  { %170 = vsyncmov [#allocation3] }
 0x1d6   :  { %s171_s4 = vpop.sfrf %170 }
 0x1d7   :  { %p186_p8 = scmp.ne.s32.totalorder %s171_s4, 0 }
 0x1d9   :  { %175 = shalt.err (%p186_p8)  }

</bundles_post_ra>
